<compile_context>
chip_gen: v6e
topology: v6e:2x2x1
jax: 0.10.0
libtpu: 0.0.40
codegen_flags: <defaults>
</compile_context>

<pallas_src>
import jax
import jax.numpy as jnp
from jax.experimental import pallas as pl
from jax.experimental.pallas import tpu as pltpu


def _round_up(x: int, m: int) -> int:
    return (x + m - 1) // m * m


# ---------------------------------------------------------------------------
# Kernels
# ---------------------------------------------------------------------------
def _linear_whole_kernel(x_ref, wt_ref, b_ref, o_ref):
    """Gridless path: whole operands live in VMEM, single MXU matmul + bias."""
    acc = jnp.dot(x_ref[...], wt_ref[...], preferred_element_type=jnp.float32)
    o_ref[...] = (acc + b_ref[...].astype(jnp.float32)).astype(o_ref.dtype)


def _linear_tiled_kernel(x_ref, wt_ref, b_ref, o_ref, acc_ref):
    """Tiled path: grid = (M/tm, N/tn, K/tk) with f32 accumulator scratch."""
    k = pl.program_id(2)

    @pl.when(k == 0)
    def _():
        acc_ref[...] = jnp.zeros_like(acc_ref)

    acc_ref[...] += jnp.dot(x_ref[...], wt_ref[...],
                            preferred_element_type=jnp.float32)

    @pl.when(k == pl.num_programs(2) - 1)
    def _():
        o_ref[...] = (acc_ref[...] + b_ref[...].astype(jnp.float32)
                      ).astype(o_ref.dtype)


# ---------------------------------------------------------------------------
# Wrapper: MockLinear.forward == torch.nn.functional.linear(x, weight, bias)
# ---------------------------------------------------------------------------
def mock_linear(x, weight, bias, *, tm=512, tn=512, tk=512,
                small_vmem_bytes=8 * 1024 * 1024):
    orig_lead = x.shape[:-1]
    K = x.shape[-1]
    N, K_w = weight.shape
    assert K == K_w, "in_features mismatch"

    x2d = x.reshape(-1, K)                 # (M, K)
    M = x2d.shape[0]
    wt = weight.T                          # (K, N): kernel does x2d @ wt
    b2d = bias.reshape(1, N)               # keep 2-D for clean VMEM layout

    itemsize = jnp.dtype(x.dtype).itemsize
    total_bytes = (M * K + K * N + N + M * N) * itemsize

    if total_bytes <= small_vmem_bytes:
        # Everything fits comfortably in VMEM: one gridless invocation.
        out2d = pl.pallas_call(
            _linear_whole_kernel,
            out_shape=jax.ShapeDtypeStruct((M, N), x.dtype),
            in_specs=[
                pl.BlockSpec(memory_space=pltpu.MemorySpace.VMEM),
                pl.BlockSpec(memory_space=pltpu.MemorySpace.VMEM),
                pl.BlockSpec(memory_space=pltpu.MemorySpace.VMEM),
            ],
            out_specs=pl.BlockSpec(memory_space=pltpu.MemorySpace.VMEM),
        )(x2d, wt, b2d)
        return out2d.reshape(*orig_lead, N)

    # General path: MXU-aligned tiles (multiples of (8, 128)), pad once with
    # jnp.pad (fusable under jit), slice the result back.
    tm = min(tm, _round_up(M, 8))
    tn = min(tn, _round_up(N, 128))
    tk = min(tk, _round_up(K, 128))
    Mp, Np, Kp = _round_up(M, tm), _round_up(N, tn), _round_up(K, tk)

    xp = jnp.pad(x2d, ((0, Mp - M), (0, Kp - K))) if (Mp, Kp) != (M, K) else x2d
    wtp = jnp.pad(wt, ((0, Kp - K), (0, Np - N))) if (Kp, Np) != (K, N) else wt
    bp = jnp.pad(b2d, ((0, 0), (0, Np - N))) if Np != N else b2d

    out = pl.pallas_call(
        _linear_tiled_kernel,
        out_shape=jax.ShapeDtypeStruct((Mp, Np), x.dtype),
        grid=(Mp // tm, Np // tn, Kp // tk),
        in_specs=[
            pl.BlockSpec((tm, tk), lambda i, j, k: (i, k)),
            pl.BlockSpec((tk, tn), lambda i, j, k: (k, j)),
            pl.BlockSpec((1, tn), lambda i, j, k: (0, j)),
        ],
        out_specs=pl.BlockSpec((tm, tn), lambda i, j, k: (i, j)),
        scratch_shapes=[pltpu.VMEM((tm, tn), jnp.float32)],
        compiler_params=pltpu.CompilerParams(
            dimension_semantics=("parallel", "parallel", "arbitrary"),
            vmem_limit_bytes=64 * 1024 * 1024,
        ),
    )(xp, wtp, bp)

    if (Mp, Np) != (M, N):
        out = out[:M, :N]
    return out.reshape(*orig_lead, N)


if __name__ == "__main__":
    key = jax.random.PRNGKey(0)
    kx, kw, kb = jax.random.split(key, 3)

    batch, seq, in_features, out_features = 2, 8, 32, 64

    # Round test data to bf16-representable values so the MXU matmul (which
    # may use bf16 operand passes at default precision) and the XLA reference
    # agree to f32 accumulation rounding, independent of precision settings.
    def _bf16_exact(a):
        return a.astype(jnp.bfloat16).astype(jnp.float32)

    x = _bf16_exact(jax.random.normal(kx, (batch, seq, in_features), jnp.float32))
    weight = _bf16_exact(jax.random.normal(kw, (out_features, in_features), jnp.float32))
    bias = _bf16_exact(jax.random.normal(kb, (out_features,), jnp.float32))

    y = jax.jit(mock_linear)(x, weight, bias)
    y = jax.block_until_ready(y)

    # Reference: torch.nn.functional.linear(x, weight, bias) == x @ W^T + b
    y_ref = jnp.einsum("bsk,nk->bsn", x, weight) + bias

    assert y.shape == y_ref.shape and y.dtype == x.dtype
    assert bool(jnp.allclose(y, y_ref, rtol=1e-4, atol=1e-4))

    print("KERNEL_OK")
</pallas_src>

<mosaic_0001>
module attributes {stable_mosaic.version = 11 : i64} {
  func.func @_linear_whole_kernel(%arg0: memref<16x32xf32, #tpu.memory_space<vmem>>, %arg1: memref<32x64xf32, #tpu.memory_space<vmem>>, %arg2: memref<1x64xf32, #tpu.memory_space<vmem>>, %arg3: memref<16x64xf32, #tpu.memory_space<vmem>>) attributes {dimension_semantics = [], scalar_prefetch = 0 : i64, scratch_operands = 0 : i64, tpu.core_type = #tpu.core_type<tc>} {
    %c0 = arith.constant 0 : index
    %c0_0 = arith.constant 0 : index
    %0 = vector.load %arg0[%c0, %c0_0] : memref<16x32xf32, #tpu.memory_space<vmem>>, vector<16x32xf32>
    %c0_1 = arith.constant 0 : index
    %c0_2 = arith.constant 0 : index
    %1 = vector.load %arg1[%c0_1, %c0_2] : memref<32x64xf32, #tpu.memory_space<vmem>>, vector<32x64xf32>
    %cst = arith.constant dense<0.000000e+00> : vector<16x64xf32>
    %2 = tpu.matmul %0, %1, %cst {dimension_numbers = #tpu.dot_dimension_numbers<[1], [0], [0], [1], [0, 0, 1, 1], [], []>} : vector<16x32xf32>, vector<32x64xf32>, vector<16x64xf32> -> vector<16x64xf32>
    %c0_3 = arith.constant 0 : index
    %c0_4 = arith.constant 0 : index
    %3 = vector.load %arg2[%c0_3, %c0_4] : memref<1x64xf32, #tpu.memory_space<vmem>>, vector<1x64xf32>
    %4 = vector.broadcast %3 : vector<1x64xf32> to vector<16x64xf32>
    %5 = arith.addf %2, %4 : vector<16x64xf32>
    %c0_5 = arith.constant 0 : index
    %c0_6 = arith.constant 0 : index
    %6 = vector.load %arg3[%c0_5, %c0_6] : memref<16x64xf32, #tpu.memory_space<vmem>>, vector<16x64xf32>
    tpu.vector_store %arg3[%c0_5, %c0_6], %5 {strides = array<i32>} : memref<16x64xf32, #tpu.memory_space<vmem>>, vector<16x64xf32>,
    return
  }
}

</mosaic_0001>

<bundles_post_ra>
// kernel: mock_linear.1
= control target key start
LH: loop header
LB: loop body
LE: loop exit
PB: predicated region body
PF: predicated region fallthrough
CT: control target
= control target key end

     0   :  { %8 = vsyncpa [#allocation3], 0  ;;  %s298_s0 = inlined_call_operand.hbm [shape: f32[16,32], index: 0, kind: input, shape index: {}]   ;;  %s299_s1 = inlined_call_operand.hbm [shape: f32[32,64], index: 1, kind: input, shape index: {}]   ;;  %s300_s2 = inlined_call_operand.vmem [shape: f32[1,64], index: 2, kind: input, shape index: {}]   ;;  %s301_s3 = inlined_call_operand.hbm [shape: f32[16,64], index: 3, kind: output, shape index: {}]  }
   0x1   :  { %9 = vsyncpa [#allocation6], 0 }
   0x2   :  { %10 = vsyncpa [#allocation4], 0  ;;  %s250_s12 = smov [#allocation2]  }
   0x3   :  { %s16_s13 = sshll.u32 %s250_s12, 4  ;;  %s17_s13 = int_to_ptr.vmem [resolvable:$true] %s16_s13 }
   0x4   :  { %s192_s14 = scalar_lea.vmem %s17_s13, 256  ;;  %p197_p1 = scmp.lt.s32.totalorder %s17_s13, %s17_s13 }
   0x5   :  { %p193_p0 = scmp.ne.s32.totalorder %s17_s13, %s192_s14  ;;  %p198_p2 = scmp.lt.s32.totalorder %s192_s14, %s192_s14 }
   0x7   :  { %p199_p3 = por %p198_p2, %p197_p1 }
   0x9   :  { %p200_p4 = pnand %p199_p3, %p193_p0 }
   0xb   :  { %203 = shalt.err (!%p200_p4)
}
   0xc   :  { %s251_s15 = smov 128   ;;  %s252_s16 = smov 8  }
   0xd   :  { %22 = dma.hbm_to_vmem [thread:$0]  %s298_s0, 256, %s17_s13, [#allocation3], %s251_s15, %s251_s15, %s252_s16  }
   0xe   :  { %s253_s19 = smov [#allocation5]  }
   0xf   :  { %s28_s20 = sshll.u32 %s253_s19, 4  ;;  %s29_s20 = int_to_ptr.vmem [resolvable:$true] %s28_s20 }
  0x10   :  { %s212_s21 = scalar_lea.vmem %s29_s20, 512  ;;  %p217_p6 = scmp.lt.s32.totalorder %s29_s20, %s29_s20 }
  0x11   :  { %p213_p5 = scmp.ne.s32.totalorder %s29_s20, %s212_s21  ;;  %p218_p7 = scmp.lt.s32.totalorder %s212_s21, %s212_s21 }
  0x13   :  { %p219_p8 = por %p218_p7, %p217_p6 }
  0x15   :  { %p220_p9 = pnand %p219_p8, %p213_p5 }
  0x17   :  { %223 = shalt.err (!%p220_p9)
}
  0x18   :  { %34 = dma.hbm_to_vmem [thread:$0]  %s299_s1, 512, %s29_s20, [#allocation6], %s251_s15, %s251_s15, %s252_s16  }
  0x19   :  { %244 = dma.done.wait [#allocation3], 256  }
  0x1a   :  { %245 = vsyncadd [#allocation3], 4294967040 }
  0x1b   :  { %246 = dma.done.wait [#allocation6], 512  }
  0x1c   :  { %247 = vsyncadd [#allocation6], 4294966784  ;;  %vm56_vm0 = vcmask 261120   ;;  %v48_v0 = vld [vmem:[#allocation5 + $0x18] sm:$0xff]  ;;  %v47_v1 = vld [vmem:[#allocation5 + $0x10] sm:$0xff]  ;;  %vm138_vm1 = vcmask 523264  }
  0x1d   :  { %168 = vmatprep.subr.mxu0 %v48_v0  ;;  %v43_v2 = vld [vmem:[#allocation2] sm:$0xff]  ;;  %v46_v3 = vld [vmem:[#allocation5 + $0x8] sm:$0xff]  ;;  %v45_v4 = vld [vmem:[#allocation5] sm:$0xff]  ;;  %s254_s24 = smov [#allocation7]  }
  0x1e   :  { %169 = vmatpush3.msra.mxu0 %v48_v0  ;;  %176 = vmatprep.mubr.msk.f32.mxu0 %vm56_vm0, %v43_v2  ;;  %v44_v5 = vld [vmem:[#allocation2 + $0x8] sm:$0xff]  ;;  %v159_v6 = vld [vmem:[%s300_s2] ss:$0 sm:$0xff]  ;;  %s146_s25 = sshll.u32 %s254_s24, 4  ;;  %s147_s25 = int_to_ptr.vmem [resolvable:$true] %s146_s25 }
  0x1f   :  { %170 = vmatprep.subr.mxu0 %v47_v1  ;;  %s224_s26 = scalar_lea.vmem %s147_s25, 256  ;;  %p229_p11 = scmp.lt.s32.totalorder %s147_s25, %s147_s25 }
  0x20   :  { %171 = vmatpush3.msra.mxu0 %v47_v1  ;;  %p225_p10 = scmp.ne.s32.totalorder %s147_s25, %s224_s26  ;;  %p230_p12 = scmp.lt.s32.totalorder %s224_s26, %s224_s26 }
  0x21   :  { %172 = vmatprep.subr.mxu0 %v46_v3 }
  0x22   :  { %173 = vmatpush3.msra.mxu0 %v46_v3  ;;  %p231_p13 = por %p230_p12, %p229_p11 }
  0x23   :  { %174 = vmatprep.subr.mxu0 %v45_v4 }
  0x24   :  { %175 = vmatpush3.msra.mxu0 %v45_v4  ;;  %p232_p0 = pnand %p231_p13, %p225_p10 }
  0x25   :  { %177 = vmatmul.mubr.msk.f32.vlgmr.msra.gmra.mxu0 %vm56_vm0, %v44_v5 }
  0xe5   :  { %v178_v7 = vpop.f32.mrf.mxu0 }
  0xe6   :  { %v135_v8 = vadd.f32 %v178_v7, %v159_v6 }
  0xe7   :  { %v129_v9 = vpop.f32.mrf.mxu0 }
  0xe8   :  { %v130_v10 = vadd.f32 %v159_v6, %v129_v9  ;;  %140 = vst.msk [vmem:[#allocation7 + $0x8] sm:$0xff] %vm138_vm1, %v135_v8 }
  0xea   :  { %139 = vst.msk [vmem:[#allocation7] sm:$0xff] %vm138_vm1, %v130_v10 }
  0xeb   :  { %235 = shalt.err (!%p232_p0)
}
  0xec   :  { %152 = dma.vmem_to_hbm [thread:$0]  %s147_s25, 256, %s301_s3, [#allocation4], %s251_s15, %s251_s15, %s252_s16  }
  0xed   :  { %248 = dma.done.wait [#allocation4], 256  }
  0xee   :  { %249 = vsyncadd [#allocation4], 4294967040 }
  0xef   :  { %156 = vsyncpa [#allocation3], 1 }
  0xf0   :  { %157 = vsyncpa [#allocation6], 1 }
  0xf1   :  { %158 = vsyncpa [#allocation4], 1 }

</bundles_post_ra>
